<compile_context>
chip_gen: v5e
topology: v5e:2x2
jax: 0.10.0
libtpu: 0.0.40
codegen_flags: <defaults>
</compile_context>

<pallas_src>
import jax
import jax.numpy as jnp
from jax import lax
from jax.experimental import pallas as pl
from jax.experimental.pallas import tpu as pltpu

# Small, forward-consistent shapes.
INPUT_DIM = 16           # module input_dim
OUTPUT_DIM = 32          # module output_dim (GGNN hidden)
NUM_STEPS = 3            # GGNN layers
NUM_NODES = 16           # sequence length L for the Conv1d branches
NUM_EDGES = 40
CONCAT_DIM = INPUT_DIM + OUTPUT_DIM      # 48  (Z branch width)
FUSED_DIM = OUTPUT_DIM + CONCAT_DIM      # 80  (lane-concat of both branches)
BN_EPS = 1e-5


def _vmem_spec():
    return pl.BlockSpec(memory_space=pltpu.MemorySpace.VMEM)


def _sigmoid(x):
    # Stable logistic on the EUP via tanh: sigmoid(x) = 0.5*(1 + tanh(x/2)).
    return 0.5 * (jnp.tanh(0.5 * x) + 1.0)


# ---------------------------------------------------------------------------
# The single fused kernel.
# ---------------------------------------------------------------------------
def devign_kernel(x_ref, src_ref, dst_ref,
                  w_ref, wi_ref, wh_ref, bi_ref, bh_ref,
                  w1_ref, b1_ref, w2_ref, b2_ref, scale_ref, shift_ref,
                  wy_ref, by_ref, wz_ref, bz_ref,
                  out_ref, y1_scr, y2_scr):
    f32 = jnp.float32
    n, din = x_ref.shape
    d = wi_ref.shape[0]                  # GGNN hidden size
    num_steps = w_ref.shape[0]
    e = src_ref.shape[0]

    x = x_ref[...]                       # (N, din)

    # ---- dense adjacency from edge list: A[i, j] = #edges with dst=i, src=j ----
    dst = dst_ref[...]                   # (1, E) int32
    src = src_ref[...]                   # (E, 1) int32
    rows = lax.broadcasted_iota(jnp.int32, (n, e), 0)
    cols = lax.broadcasted_iota(jnp.int32, (e, n), 1)
    onehot_dst = (rows == dst).astype(f32)                       # (N, E)
    onehot_src = (cols == src).astype(f32)                       # (E, N)
    adj = jnp.dot(onehot_dst, onehot_src, preferred_element_type=f32)  # (N, N)

    # ---- GatedGraphConv: zero-pad features to D, unrolled GRU steps ----
    h = jnp.concatenate([x, jnp.zeros((n, d - din), f32)], axis=-1)    # (N, D)
    wi = wi_ref[...]                    # (D, 3D)  [r | z | n]
    wh = wh_ref[...]                    # (D, 3D)
    bi = bi_ref[...]                    # (1, 3D)
    bh = bh_ref[...]                    # (1, 3D)
    for i in range(num_steps):          # static unroll: LLO sees across steps
        hw = jnp.dot(h, w_ref[i], preferred_element_type=f32)          # (N, D)
        m = jnp.dot(adj, hw, preferred_element_type=f32)               # sum aggr
        gi = jnp.dot(m, wi, preferred_element_type=f32) + bi           # (N, 3D)
        gh = jnp.dot(h, wh, preferred_element_type=f32) + bh           # (N, 3D)
        r = _sigmoid(gi[:, 0:d] + gh[:, 0:d])
        z = _sigmoid(gi[:, d:2 * d] + gh[:, d:2 * d])
        cand = jnp.tanh(gi[:, 2 * d:3 * d] + r * gh[:, 2 * d:3 * d])
        h = (1.0 - z) * cand + z * h

    # ---- fused Y/Z conv branch on lane-concat slab [h | h | x] = [h | c] ----
    slab = jnp.concatenate([h, h, x], axis=-1)                   # (N, CF=2D+din)
    cf = slab.shape[1]
    l1 = n - 2                                                   # Conv1d k=3
    p1_len = (l1 - 3) // 2 + 1                                   # MaxPool1d(3, 2)
    p2_len = (p1_len - 2) // 2 + 1                               # MaxPool1d(2, 2)

    scale = scale_ref[...]
    shift = shift_ref[...]

    # conv1 (k=3) as one im2col matmul (contraction depth 3*CF).
    cols3 = jnp.concatenate([slab[k:k + l1, :] for k in range(3)], axis=-1)
    y1 = jnp.maximum(
        (jnp.dot(cols3, w1_ref[...], preferred_element_type=f32) + b1_ref[...])
        * scale + shift, 0.0)
    y1_scr[...] = y1

    # MaxPool1d(3, stride=2) via strided sublane reads + VPU max.
    p1 = jnp.maximum(
        jnp.maximum(y1_scr[pl.ds(0, p1_len, stride=2), :],
                    y1_scr[pl.ds(1, p1_len, stride=2), :]),
        y1_scr[pl.ds(2, p1_len, stride=2), :])

    # conv2 (k=1) + same BN affine + ReLU.
    y2 = jnp.maximum(
        (jnp.dot(p1, w2_ref[...], preferred_element_type=f32) + b2_ref[...])
        * scale + shift, 0.0)
    y2_scr[...] = y2

    # MaxPool1d(2, stride=2).
    p2 = jnp.maximum(y2_scr[pl.ds(0, p2_len, stride=2), :],
                     y2_scr[pl.ds(1, p2_len, stride=2), :])

    # ---- head: sigmoid(mean(mlp_y(Y_2) * mlp_z(Z_2))) ----
    yy = jnp.dot(p2, wy_ref[...], preferred_element_type=f32) + by_ref[...]
    zz = jnp.dot(p2, wz_ref[...], preferred_element_type=f32) + bz_ref[...]
    avg = jnp.mean(yy * zz, axis=0, keepdims=True)               # (1, 2)
    out_ref[...] = _sigmoid(avg)


def devign_call(x, src_col, dst_row, p):
    n, _ = x.shape
    cf = FUSED_DIM
    l1 = n - 2
    p1_len = (l1 - 3) // 2 + 1
    args = (x, src_col, dst_row,
            p["w"], p["wi"], p["wh"], p["bi"], p["bh"],
            p["w1"], p["b1"], p["w2"], p["b2"], p["bn_scale"], p["bn_shift"],
            p["wy"], p["by"], p["wz"], p["bz"])
    return pl.pallas_call(
        devign_kernel,
        out_shape=jax.ShapeDtypeStruct((1, 2), jnp.float32),
        in_specs=[_vmem_spec() for _ in args],
        out_specs=_vmem_spec(),
        scratch_shapes=[pltpu.VMEM((l1, cf), jnp.float32),
                        pltpu.VMEM((p1_len, cf), jnp.float32)],
    )(*args)


# ---------------------------------------------------------------------------
# Parameter init (deterministic, synthetic) — weights prefused at init time.
# ---------------------------------------------------------------------------
def _bn_affine(key, c):
    k1, k2, k3, k4 = jax.random.split(key, 4)
    gamma = 1.0 + 0.1 * jax.random.normal(k1, (c,), jnp.float32)
    beta = 0.1 * jax.random.normal(k2, (c,), jnp.float32)
    mean = 0.1 * jax.random.normal(k3, (c,), jnp.float32)
    var = 1.0 + 0.1 * jax.random.uniform(k4, (c,), jnp.float32)
    scale = gamma / jnp.sqrt(var + BN_EPS)
    shift = beta - mean * scale
    return scale.reshape(1, c), shift.reshape(1, c)


def _block_diag(a, b):
    da, db = a.shape[0], b.shape[0]
    top = jnp.concatenate([a, jnp.zeros((da, db), jnp.float32)], axis=1)
    bot = jnp.concatenate([jnp.zeros((db, da), jnp.float32), b], axis=1)
    return jnp.concatenate([top, bot], axis=0)


def init_params(key):
    d, din = OUTPUT_DIM, INPUT_DIM
    dc = d + din
    cf = d + dc
    keys = iter(jax.random.split(key, 40))

    def nrm(shape, fan):
        return jax.random.normal(next(keys), shape, jnp.float32) / jnp.sqrt(fan)

    # --- GGNN: per-step propagation weight + fused GRU gate weights [r|z|n] ---
    w = nrm((NUM_STEPS, d, d), d)
    wi = jnp.concatenate([nrm((d, d), d) for _ in range(3)], axis=1)   # (D, 3D)
    wh = jnp.concatenate([nrm((d, d), d) for _ in range(3)], axis=1)
    bi = jnp.concatenate([nrm((1, d), d) for _ in range(3)], axis=1)   # (1, 3D)
    bh = jnp.concatenate([nrm((1, d), d) for _ in range(3)], axis=1)

    # --- conv branches (Y width d, Z width dc) fused block-diagonally to cf ---
    w1_y = nrm((3, d, d), 3 * d);     b1_y = nrm((1, d), d)
    w2_y = nrm((d, d), d);            b2_y = nrm((1, d), d)
    sc_y, sh_y = _bn_affine(next(keys), d)
    w1_z = nrm((3, dc, dc), 3 * dc);  b1_z = nrm((1, dc), dc)
    w2_z = nrm((dc, dc), dc);         b2_z = nrm((1, dc), dc)
    sc_z, sh_z = _bn_affine(next(keys), dc)

    w1 = jnp.stack([_block_diag(w1_y[k], w1_z[k]) for k in range(3)], axis=0)
    w1 = w1.reshape(3 * cf, cf)       # im2col layout: row = tap*cf + cin
    b1 = jnp.concatenate([b1_y, b1_z], axis=1)
    w2 = _block_diag(w2_y, w2_z)
    b2 = jnp.concatenate([b2_y, b2_z], axis=1)
    bn_scale = jnp.concatenate([sc_y, sc_z], axis=1)
    bn_shift = jnp.concatenate([sh_y, sh_z], axis=1)

    # --- head: mlp_y reads slab cols [0:d], mlp_z reads slab cols [d:cf] ---
    wy = jnp.concatenate([nrm((d, 2), d), jnp.zeros((dc, 2), jnp.float32)], axis=0)
    by = nrm((1, 2), d)
    wz = jnp.concatenate([jnp.zeros((d, 2), jnp.float32), nrm((dc, 2), dc)], axis=0)
    bz = nrm((1, 2), dc)

    return {"w": w, "wi": wi, "wh": wh, "bi": bi, "bh": bh,
            "w1": w1, "b1": b1, "w2": w2, "b2": b2,
            "bn_scale": bn_scale, "bn_shift": bn_shift,
            "wy": wy, "by": by, "wz": wz, "bz": bz}


def devign_forward(x, edge_index, params):
    # TODO(synk): the reference's .to('cuda:0') moves and de_batchify_graphs
    # (batch-of-1 stack) are device/plumbing no-ops here.
    src_col = edge_index[0].reshape(-1, 1).astype(jnp.int32)   # (E, 1)
    dst_row = edge_index[1].reshape(1, -1).astype(jnp.int32)   # (1, E)
    return devign_call(x, src_col, dst_row, params)            # (1, 2)


if __name__ == "__main__":
    key = jax.random.PRNGKey(0)
    k_x, k_e, k_p = jax.random.split(key, 3)
    x = jax.random.normal(k_x, (NUM_NODES, INPUT_DIM), jnp.float32)
    edge_index = jax.random.randint(
        k_e, (2, NUM_EDGES), 0, NUM_NODES, dtype=jnp.int32)
    params = init_params(k_p)

    out = devign_forward(x, edge_index, params)
    out = jax.block_until_ready(out)
    assert out.shape == (1, 2)
    assert bool(jnp.all(jnp.isfinite(out)))
    assert bool(jnp.all((out >= 0.0) & (out <= 1.0)))
    print("KERNEL_OK")
</pallas_src>

<mosaic_0001>
module attributes {stable_mosaic.version = 11 : i64} {
  func.func @devign_kernel(%arg0: memref<16x16xf32, #tpu.memory_space<vmem>>, %arg1: memref<40x1xi32, #tpu.memory_space<vmem>>, %arg2: memref<1x40xi32, #tpu.memory_space<vmem>>, %arg3: memref<3x32x32xf32, #tpu.memory_space<vmem>>, %arg4: memref<32x96xf32, #tpu.memory_space<vmem>>, %arg5: memref<32x96xf32, #tpu.memory_space<vmem>>, %arg6: memref<1x96xf32, #tpu.memory_space<vmem>>, %arg7: memref<1x96xf32, #tpu.memory_space<vmem>>, %arg8: memref<240x80xf32, #tpu.memory_space<vmem>>, %arg9: memref<1x80xf32, #tpu.memory_space<vmem>>, %arg10: memref<80x80xf32, #tpu.memory_space<vmem>>, %arg11: memref<1x80xf32, #tpu.memory_space<vmem>>, %arg12: memref<1x80xf32, #tpu.memory_space<vmem>>, %arg13: memref<1x80xf32, #tpu.memory_space<vmem>>, %arg14: memref<80x2xf32, #tpu.memory_space<vmem>>, %arg15: memref<1x2xf32, #tpu.memory_space<vmem>>, %arg16: memref<80x2xf32, #tpu.memory_space<vmem>>, %arg17: memref<1x2xf32, #tpu.memory_space<vmem>>, %arg18: memref<1x2xf32, #tpu.memory_space<vmem>>, %arg19: memref<14x80xf32, #tpu.memory_space<vmem>>, %arg20: memref<6x80xf32, #tpu.memory_space<vmem>>) attributes {dimension_semantics = [], scalar_prefetch = 0 : i64, scratch_operands = 2 : i64, tpu.core_type = #tpu.core_type<tc>} {
    %c0 = arith.constant 0 : index
    %c0_0 = arith.constant 0 : index
    %0 = vector.load %arg0[%c0, %c0_0] : memref<16x16xf32, #tpu.memory_space<vmem>>, vector<16x16xf32>
    %c0_1 = arith.constant 0 : index
    %c0_2 = arith.constant 0 : index
    %1 = vector.load %arg2[%c0_1, %c0_2] : memref<1x40xi32, #tpu.memory_space<vmem>>, vector<1x40xi32>
    %c0_3 = arith.constant 0 : index
    %c0_4 = arith.constant 0 : index
    %2 = vector.load %arg1[%c0_3, %c0_4] : memref<40x1xi32, #tpu.memory_space<vmem>>, vector<40x1xi32>
    %3 = tpu.iota {dimensions = array<i32: 0>} : vector<16x40xi32>
    %4 = tpu.iota {dimensions = array<i32: 1>} : vector<40x16xi32>
    %5 = vector.broadcast %1 : vector<1x40xi32> to vector<16x40xi32>
    %6 = arith.cmpi eq, %3, %5 : vector<16x40xi32>
    %7 = arith.extui %6 : vector<16x40xi1> to vector<16x40xi32>
    %8 = arith.sitofp %7 : vector<16x40xi32> to vector<16x40xf32>
    %9 = vector.broadcast %2 : vector<40x1xi32> to vector<40x16xi32>
    %10 = arith.cmpi eq, %4, %9 : vector<40x16xi32>
    %11 = arith.extui %10 : vector<40x16xi1> to vector<40x16xi32>
    %12 = arith.sitofp %11 : vector<40x16xi32> to vector<40x16xf32>
    %cst = arith.constant dense<0.000000e+00> : vector<16x16xf32>
    %13 = tpu.matmul %8, %12, %cst {dimension_numbers = #tpu.dot_dimension_numbers<[1], [0], [0], [1], [0, 0, 1, 1], [], []>} : vector<16x40xf32>, vector<40x16xf32>, vector<16x16xf32> -> vector<16x16xf32>
    %cst_5 = arith.constant 0.000000e+00 : f32
    %14 = vector.broadcast %cst_5 : f32 to vector<16x16xf32>
    %15 = tpu.concatenate %0, %14 in 1 : vector<16x16xf32>, vector<16x16xf32> -> vector<16x32xf32>
    %c0_6 = arith.constant 0 : index
    %c0_7 = arith.constant 0 : index
    %16 = vector.load %arg4[%c0_6, %c0_7] : memref<32x96xf32, #tpu.memory_space<vmem>>, vector<32x96xf32>
    %c0_8 = arith.constant 0 : index
    %c0_9 = arith.constant 0 : index
    %17 = vector.load %arg5[%c0_8, %c0_9] : memref<32x96xf32, #tpu.memory_space<vmem>>, vector<32x96xf32>
    %c0_10 = arith.constant 0 : index
    %c0_11 = arith.constant 0 : index
    %18 = vector.load %arg6[%c0_10, %c0_11] : memref<1x96xf32, #tpu.memory_space<vmem>>, vector<1x96xf32>
    %c0_12 = arith.constant 0 : index
    %c0_13 = arith.constant 0 : index
    %19 = vector.load %arg7[%c0_12, %c0_13] : memref<1x96xf32, #tpu.memory_space<vmem>>, vector<1x96xf32>
    %c0_14 = arith.constant 0 : index
    %c0_15 = arith.constant 0 : index
    %c0_16 = arith.constant 0 : index
    %20 = vector.load %arg3[%c0_14, %c0_15, %c0_16] : memref<3x32x32xf32, #tpu.memory_space<vmem>>, vector<1x32x32xf32>
    %21 = vector.shape_cast %20 : vector<1x32x32xf32> to vector<32x32xf32>
    %cst_17 = arith.constant dense<0.000000e+00> : vector<16x32xf32>
    %22 = tpu.matmul %15, %21, %cst_17 {dimension_numbers = #tpu.dot_dimension_numbers<[1], [0], [0], [1], [0, 0, 1, 1], [], []>} : vector<16x32xf32>, vector<32x32xf32>, vector<16x32xf32> -> vector<16x32xf32>
    %cst_18 = arith.constant dense<0.000000e+00> : vector<16x32xf32>
    %23 = tpu.matmul %13, %22, %cst_18 {dimension_numbers = #tpu.dot_dimension_numbers<[1], [0], [0], [1], [0, 0, 1, 1], [], []>} : vector<16x16xf32>, vector<16x32xf32>, vector<16x32xf32> -> vector<16x32xf32>
    %cst_19 = arith.constant dense<0.000000e+00> : vector<16x96xf32>
    %24 = tpu.matmul %23, %16, %cst_19 {dimension_numbers = #tpu.dot_dimension_numbers<[1], [0], [0], [1], [0, 0, 1, 1], [], []>} : vector<16x32xf32>, vector<32x96xf32>, vector<16x96xf32> -> vector<16x96xf32>
    %25 = vector.broadcast %18 : vector<1x96xf32> to vector<16x96xf32>
    %26 = arith.addf %24, %25 : vector<16x96xf32>
    %cst_20 = arith.constant dense<0.000000e+00> : vector<16x96xf32>
    %27 = tpu.matmul %15, %17, %cst_20 {dimension_numbers = #tpu.dot_dimension_numbers<[1], [0], [0], [1], [0, 0, 1, 1], [], []>} : vector<16x32xf32>, vector<32x96xf32>, vector<16x96xf32> -> vector<16x96xf32>
    %28 = vector.broadcast %19 : vector<1x96xf32> to vector<16x96xf32>
    %29 = arith.addf %27, %28 : vector<16x96xf32>
    %30 = vector.extract_strided_slice %26 {offsets = [0, 0], sizes = [16, 32], strides = [1, 1]} : vector<16x96xf32> to vector<16x32xf32>
    %31 = vector.extract_strided_slice %29 {offsets = [0, 0], sizes = [16, 32], strides = [1, 1]} : vector<16x96xf32> to vector<16x32xf32>
    %32 = arith.addf %30, %31 : vector<16x32xf32>
    %cst_21 = arith.constant 5.000000e-01 : f32
    %33 = vector.broadcast %cst_21 : f32 to vector<16x32xf32>
    %34 = arith.mulf %33, %32 : vector<16x32xf32>
    %35 = math.tanh %34 : vector<16x32xf32>
    %cst_22 = arith.constant 1.000000e+00 : f32
    %36 = vector.broadcast %cst_22 : f32 to vector<16x32xf32>
    %37 = arith.addf %35, %36 : vector<16x32xf32>
    %cst_23 = arith.constant 5.000000e-01 : f32
    %38 = vector.broadcast %cst_23 : f32 to vector<16x32xf32>
    %39 = arith.mulf %38, %37 : vector<16x32xf32>
    %40 = vector.extract_strided_slice %26 {offsets = [0, 32], sizes = [16, 32], strides = [1, 1]} : vector<16x96xf32> to vector<16x32xf32>
    %41 = vector.extract_strided_slice %29 {offsets = [0, 32], sizes = [16, 32], strides = [1, 1]} : vector<16x96xf32> to vector<16x32xf32>
    %42 = arith.addf %40, %41 : vector<16x32xf32>
    %cst_24 = arith.constant 5.000000e-01 : f32
    %43 = vector.broadcast %cst_24 : f32 to vector<16x32xf32>
    %44 = arith.mulf %43, %42 : vector<16x32xf32>
    %45 = math.tanh %44 : vector<16x32xf32>
    %cst_25 = arith.constant 1.000000e+00 : f32
    %46 = vector.broadcast %cst_25 : f32 to vector<16x32xf32>
    %47 = arith.addf %45, %46 : vector<16x32xf32>
    %cst_26 = arith.constant 5.000000e-01 : f32
    %48 = vector.broadcast %cst_26 : f32 to vector<16x32xf32>
    %49 = arith.mulf %48, %47 : vector<16x32xf32>
    %50 = vector.extract_strided_slice %26 {offsets = [0, 64], sizes = [16, 32], strides = [1, 1]} : vector<16x96xf32> to vector<16x32xf32>
    %51 = vector.extract_strided_slice %29 {offsets = [0, 64], sizes = [16, 32], strides = [1, 1]} : vector<16x96xf32> to vector<16x32xf32>
    %52 = arith.mulf %39, %51 : vector<16x32xf32>
    %53 = arith.addf %50, %52 : vector<16x32xf32>
    %54 = math.tanh %53 : vector<16x32xf32>
    %cst_27 = arith.constant 1.000000e+00 : f32
    %55 = vector.broadcast %cst_27 : f32 to vector<16x32xf32>
    %56 = arith.subf %55, %49 : vector<16x32xf32>
    %57 = arith.mulf %56, %54 : vector<16x32xf32>
    %58 = arith.mulf %49, %15 : vector<16x32xf32>
    %59 = arith.addf %57, %58 : vector<16x32xf32>
    %c1 = arith.constant 1 : index
    %c0_28 = arith.constant 0 : index
    %c0_29 = arith.constant 0 : index
    %60 = vector.load %arg3[%c1, %c0_28, %c0_29] : memref<3x32x32xf32, #tpu.memory_space<vmem>>, vector<1x32x32xf32>
    %61 = vector.shape_cast %60 : vector<1x32x32xf32> to vector<32x32xf32>
    %cst_30 = arith.constant dense<0.000000e+00> : vector<16x32xf32>
    %62 = tpu.matmul %59, %61, %cst_30 {dimension_numbers = #tpu.dot_dimension_numbers<[1], [0], [0], [1], [0, 0, 1, 1], [], []>} : vector<16x32xf32>, vector<32x32xf32>, vector<16x32xf32> -> vector<16x32xf32>
    %cst_31 = arith.constant dense<0.000000e+00> : vector<16x32xf32>
    %63 = tpu.matmul %13, %62, %cst_31 {dimension_numbers = #tpu.dot_dimension_numbers<[1], [0], [0], [1], [0, 0, 1, 1], [], []>} : vector<16x16xf32>, vector<16x32xf32>, vector<16x32xf32> -> vector<16x32xf32>
    %cst_32 = arith.constant dense<0.000000e+00> : vector<16x96xf32>
    %64 = tpu.matmul %63, %16, %cst_32 {dimension_numbers = #tpu.dot_dimension_numbers<[1], [0], [0], [1], [0, 0, 1, 1], [], []>} : vector<16x32xf32>, vector<32x96xf32>, vector<16x96xf32> -> vector<16x96xf32>
    %65 = vector.broadcast %18 : vector<1x96xf32> to vector<16x96xf32>
    %66 = arith.addf %64, %65 : vector<16x96xf32>
    %cst_33 = arith.constant dense<0.000000e+00> : vector<16x96xf32>
    %67 = tpu.matmul %59, %17, %cst_33 {dimension_numbers = #tpu.dot_dimension_numbers<[1], [0], [0], [1], [0, 0, 1, 1], [], []>} : vector<16x32xf32>, vector<32x96xf32>, vector<16x96xf32> -> vector<16x96xf32>
    %68 = vector.broadcast %19 : vector<1x96xf32> to vector<16x96xf32>
    %69 = arith.addf %67, %68 : vector<16x96xf32>
    %70 = vector.extract_strided_slice %66 {offsets = [0, 0], sizes = [16, 32], strides = [1, 1]} : vector<16x96xf32> to vector<16x32xf32>
    %71 = vector.extract_strided_slice %69 {offsets = [0, 0], sizes = [16, 32], strides = [1, 1]} : vector<16x96xf32> to vector<16x32xf32>
    %72 = arith.addf %70, %71 : vector<16x32xf32>
    %cst_34 = arith.constant 5.000000e-01 : f32
    %73 = vector.broadcast %cst_34 : f32 to vector<16x32xf32>
    %74 = arith.mulf %73, %72 : vector<16x32xf32>
    %75 = math.tanh %74 : vector<16x32xf32>
    %cst_35 = arith.constant 1.000000e+00 : f32
    %76 = vector.broadcast %cst_35 : f32 to vector<16x32xf32>
    %77 = arith.addf %75, %76 : vector<16x32xf32>
    %cst_36 = arith.constant 5.000000e-01 : f32
    %78 = vector.broadcast %cst_36 : f32 to vector<16x32xf32>
    %79 = arith.mulf %78, %77 : vector<16x32xf32>
    %80 = vector.extract_strided_slice %66 {offsets = [0, 32], sizes = [16, 32], strides = [1, 1]} : vector<16x96xf32> to vector<16x32xf32>
    %81 = vector.extract_strided_slice %69 {offsets = [0, 32], sizes = [16, 32], strides = [1, 1]} : vector<16x96xf32> to vector<16x32xf32>
    %82 = arith.addf %80, %81 : vector<16x32xf32>
    %cst_37 = arith.constant 5.000000e-01 : f32
    %83 = vector.broadcast %cst_37 : f32 to vector<16x32xf32>
    %84 = arith.mulf %83, %82 : vector<16x32xf32>
    %85 = math.tanh %84 : vector<16x32xf32>
    %cst_38 = arith.constant 1.000000e+00 : f32
    %86 = vector.broadcast %cst_38 : f32 to vector<16x32xf32>
    %87 = arith.addf %85, %86 : vector<16x32xf32>
    %cst_39 = arith.constant 5.000000e-01 : f32
    %88 = vector.broadcast %cst_39 : f32 to vector<16x32xf32>
    %89 = arith.mulf %88, %87 : vector<16x32xf32>
    %90 = vector.extract_strided_slice %66 {offsets = [0, 64], sizes = [16, 32], strides = [1, 1]} : vector<16x96xf32> to vector<16x32xf32>
    %91 = vector.extract_strided_slice %69 {offsets = [0, 64], sizes = [16, 32], strides = [1, 1]} : vector<16x96xf32> to vector<16x32xf32>
    %92 = arith.mulf %79, %91 : vector<16x32xf32>
    %93 = arith.addf %90, %92 : vector<16x32xf32>
    %94 = math.tanh %93 : vector<16x32xf32>
    %cst_40 = arith.constant 1.000000e+00 : f32
    %95 = vector.broadcast %cst_40 : f32 to vector<16x32xf32>
    %96 = arith.subf %95, %89 : vector<16x32xf32>
    %97 = arith.mulf %96, %94 : vector<16x32xf32>
    %98 = arith.mulf %89, %59 : vector<16x32xf32>
    %99 = arith.addf %97, %98 : vector<16x32xf32>
    %c2 = arith.constant 2 : index
    %c0_41 = arith.constant 0 : index
    %c0_42 = arith.constant 0 : index
    %100 = vector.load %arg3[%c2, %c0_41, %c0_42] : memref<3x32x32xf32, #tpu.memory_space<vmem>>, vector<1x32x32xf32>
    %101 = vector.shape_cast %100 : vector<1x32x32xf32> to vector<32x32xf32>
    %cst_43 = arith.constant dense<0.000000e+00> : vector<16x32xf32>
    %102 = tpu.matmul %99, %101, %cst_43 {dimension_numbers = #tpu.dot_dimension_numbers<[1], [0], [0], [1], [0, 0, 1, 1], [], []>} : vector<16x32xf32>, vector<32x32xf32>, vector<16x32xf32> -> vector<16x32xf32>
    %cst_44 = arith.constant dense<0.000000e+00> : vector<16x32xf32>
    %103 = tpu.matmul %13, %102, %cst_44 {dimension_numbers = #tpu.dot_dimension_numbers<[1], [0], [0], [1], [0, 0, 1, 1], [], []>} : vector<16x16xf32>, vector<16x32xf32>, vector<16x32xf32> -> vector<16x32xf32>
    %cst_45 = arith.constant dense<0.000000e+00> : vector<16x96xf32>
    %104 = tpu.matmul %103, %16, %cst_45 {dimension_numbers = #tpu.dot_dimension_numbers<[1], [0], [0], [1], [0, 0, 1, 1], [], []>} : vector<16x32xf32>, vector<32x96xf32>, vector<16x96xf32> -> vector<16x96xf32>
    %105 = vector.broadcast %18 : vector<1x96xf32> to vector<16x96xf32>
    %106 = arith.addf %104, %105 : vector<16x96xf32>
    %cst_46 = arith.constant dense<0.000000e+00> : vector<16x96xf32>
    %107 = tpu.matmul %99, %17, %cst_46 {dimension_numbers = #tpu.dot_dimension_numbers<[1], [0], [0], [1], [0, 0, 1, 1], [], []>} : vector<16x32xf32>, vector<32x96xf32>, vector<16x96xf32> -> vector<16x96xf32>
    %108 = vector.broadcast %19 : vector<1x96xf32> to vector<16x96xf32>
    %109 = arith.addf %107, %108 : vector<16x96xf32>
    %110 = vector.extract_strided_slice %106 {offsets = [0, 0], sizes = [16, 32], strides = [1, 1]} : vector<16x96xf32> to vector<16x32xf32>
    %111 = vector.extract_strided_slice %109 {offsets = [0, 0], sizes = [16, 32], strides = [1, 1]} : vector<16x96xf32> to vector<16x32xf32>
    %112 = arith.addf %110, %111 : vector<16x32xf32>
    %cst_47 = arith.constant 5.000000e-01 : f32
    %113 = vector.broadcast %cst_47 : f32 to vector<16x32xf32>
    %114 = arith.mulf %113, %112 : vector<16x32xf32>
    %115 = math.tanh %114 : vector<16x32xf32>
    %cst_48 = arith.constant 1.000000e+00 : f32
    %116 = vector.broadcast %cst_48 : f32 to vector<16x32xf32>
    %117 = arith.addf %115, %116 : vector<16x32xf32>
    %cst_49 = arith.constant 5.000000e-01 : f32
    %118 = vector.broadcast %cst_49 : f32 to vector<16x32xf32>
    %119 = arith.mulf %118, %117 : vector<16x32xf32>
    %120 = vector.extract_strided_slice %106 {offsets = [0, 32], sizes = [16, 32], strides = [1, 1]} : vector<16x96xf32> to vector<16x32xf32>
    %121 = vector.extract_strided_slice %109 {offsets = [0, 32], sizes = [16, 32], strides = [1, 1]} : vector<16x96xf32> to vector<16x32xf32>
    %122 = arith.addf %120, %121 : vector<16x32xf32>
    %cst_50 = arith.constant 5.000000e-01 : f32
    %123 = vector.broadcast %cst_50 : f32 to vector<16x32xf32>
    %124 = arith.mulf %123, %122 : vector<16x32xf32>
    %125 = math.tanh %124 : vector<16x32xf32>
    %cst_51 = arith.constant 1.000000e+00 : f32
    %126 = vector.broadcast %cst_51 : f32 to vector<16x32xf32>
    %127 = arith.addf %125, %126 : vector<16x32xf32>
    %cst_52 = arith.constant 5.000000e-01 : f32
    %128 = vector.broadcast %cst_52 : f32 to vector<16x32xf32>
    %129 = arith.mulf %128, %127 : vector<16x32xf32>
    %130 = vector.extract_strided_slice %106 {offsets = [0, 64], sizes = [16, 32], strides = [1, 1]} : vector<16x96xf32> to vector<16x32xf32>
    %131 = vector.extract_strided_slice %109 {offsets = [0, 64], sizes = [16, 32], strides = [1, 1]} : vector<16x96xf32> to vector<16x32xf32>
    %132 = arith.mulf %119, %131 : vector<16x32xf32>
    %133 = arith.addf %130, %132 : vector<16x32xf32>
    %134 = math.tanh %133 : vector<16x32xf32>
    %cst_53 = arith.constant 1.000000e+00 : f32
    %135 = vector.broadcast %cst_53 : f32 to vector<16x32xf32>
    %136 = arith.subf %135, %129 : vector<16x32xf32>
    %137 = arith.mulf %136, %134 : vector<16x32xf32>
    %138 = arith.mulf %129, %99 : vector<16x32xf32>
    %139 = arith.addf %137, %138 : vector<16x32xf32>
    %140 = tpu.concatenate %139, %139, %0 in 1 : vector<16x32xf32>, vector<16x32xf32>, vector<16x16xf32> -> vector<16x80xf32>
    %c0_54 = arith.constant 0 : index
    %c0_55 = arith.constant 0 : index
    %141 = vector.load %arg12[%c0_54, %c0_55] : memref<1x80xf32, #tpu.memory_space<vmem>>, vector<1x80xf32>
    %c0_56 = arith.constant 0 : index
    %c0_57 = arith.constant 0 : index
    %142 = vector.load %arg13[%c0_56, %c0_57] : memref<1x80xf32, #tpu.memory_space<vmem>>, vector<1x80xf32>
    %143 = vector.extract_strided_slice %140 {offsets = [0, 0], sizes = [14, 80], strides = [1, 1]} : vector<16x80xf32> to vector<14x80xf32>
    %144 = vector.extract_strided_slice %140 {offsets = [1, 0], sizes = [14, 80], strides = [1, 1]} : vector<16x80xf32> to vector<14x80xf32>
    %145 = vector.extract_strided_slice %140 {offsets = [2, 0], sizes = [14, 80], strides = [1, 1]} : vector<16x80xf32> to vector<14x80xf32>
    %146 = tpu.concatenate %143, %144, %145 in 1 : vector<14x80xf32>, vector<14x80xf32>, vector<14x80xf32> -> vector<14x240xf32>
    %c0_58 = arith.constant 0 : index
    %c0_59 = arith.constant 0 : index
    %147 = vector.load %arg8[%c0_58, %c0_59] : memref<240x80xf32, #tpu.memory_space<vmem>>, vector<240x80xf32>
    %cst_60 = arith.constant dense<0.000000e+00> : vector<14x80xf32>
    %148 = tpu.matmul %146, %147, %cst_60 {dimension_numbers = #tpu.dot_dimension_numbers<[1], [0], [0], [1], [0, 0, 1, 1], [], []>} : vector<14x240xf32>, vector<240x80xf32>, vector<14x80xf32> -> vector<14x80xf32>
    %c0_61 = arith.constant 0 : index
    %c0_62 = arith.constant 0 : index
    %149 = vector.load %arg9[%c0_61, %c0_62] : memref<1x80xf32, #tpu.memory_space<vmem>>, vector<1x80xf32>
    %150 = vector.broadcast %149 : vector<1x80xf32> to vector<14x80xf32>
    %151 = arith.addf %148, %150 : vector<14x80xf32>
    %152 = vector.broadcast %141 : vector<1x80xf32> to vector<14x80xf32>
    %153 = arith.mulf %151, %152 : vector<14x80xf32>
    %154 = vector.broadcast %142 : vector<1x80xf32> to vector<14x80xf32>
    %155 = arith.addf %153, %154 : vector<14x80xf32>
    %cst_63 = arith.constant 0.000000e+00 : f32
    %156 = vector.broadcast %cst_63 : f32 to vector<14x80xf32>
    %157 = arith.maximumf %155, %156 : vector<14x80xf32>
    %c0_64 = arith.constant 0 : index
    %c0_65 = arith.constant 0 : index
    %158 = vector.load %arg19[%c0_64, %c0_65] : memref<14x80xf32, #tpu.memory_space<vmem>>, vector<14x80xf32>
    tpu.vector_store %arg19[%c0_64, %c0_65], %157 {strides = array<i32>} : memref<14x80xf32, #tpu.memory_space<vmem>>, vector<14x80xf32>,
    %c0_66 = arith.constant 0 : index
    %c0_67 = arith.constant 0 : index
    %159 = tpu.strided_load %arg19[%c0_66, %c0_67] {strides = array<i32: 2, 1>} : memref<14x80xf32, #tpu.memory_space<vmem>>, vector<6x80xf32>
    %c1_68 = arith.constant 1 : index
    %c0_69 = arith.constant 0 : index
    %160 = tpu.strided_load %arg19[%c1_68, %c0_69] {strides = array<i32: 2, 1>} : memref<14x80xf32, #tpu.memory_space<vmem>>, vector<6x80xf32>
    %161 = arith.maximumf %159, %160 : vector<6x80xf32>
    %c2_70 = arith.constant 2 : index
    %c0_71 = arith.constant 0 : index
    %162 = tpu.strided_load %arg19[%c2_70, %c0_71] {strides = array<i32: 2, 1>} : memref<14x80xf32, #tpu.memory_space<vmem>>, vector<6x80xf32>
    %163 = arith.maximumf %161, %162 : vector<6x80xf32>
    %c0_72 = arith.constant 0 : index
    %c0_73 = arith.constant 0 : index
    %164 = vector.load %arg10[%c0_72, %c0_73] : memref<80x80xf32, #tpu.memory_space<vmem>>, vector<80x80xf32>
    %cst_74 = arith.constant dense<0.000000e+00> : vector<6x80xf32>
    %165 = tpu.matmul %163, %164, %cst_74 {dimension_numbers = #tpu.dot_dimension_numbers<[1], [0], [0], [1], [0, 0, 1, 1], [], []>} : vector<6x80xf32>, vector<80x80xf32>, vector<6x80xf32> -> vector<6x80xf32>
    %c0_75 = arith.constant 0 : index
    %c0_76 = arith.constant 0 : index
    %166 = vector.load %arg11[%c0_75, %c0_76] : memref<1x80xf32, #tpu.memory_space<vmem>>, vector<1x80xf32>
    %167 = vector.broadcast %166 : vector<1x80xf32> to vector<6x80xf32>
    %168 = arith.addf %165, %167 : vector<6x80xf32>
    %169 = vector.broadcast %141 : vector<1x80xf32> to vector<6x80xf32>
    %170 = arith.mulf %168, %169 : vector<6x80xf32>
    %171 = vector.broadcast %142 : vector<1x80xf32> to vector<6x80xf32>
    %172 = arith.addf %170, %171 : vector<6x80xf32>
    %cst_77 = arith.constant 0.000000e+00 : f32
    %173 = vector.broadcast %cst_77 : f32 to vector<6x80xf32>
    %174 = arith.maximumf %172, %173 : vector<6x80xf32>
    %c0_78 = arith.constant 0 : index
    %c0_79 = arith.constant 0 : index
    %175 = vector.load %arg20[%c0_78, %c0_79] : memref<6x80xf32, #tpu.memory_space<vmem>>, vector<6x80xf32>
    tpu.vector_store %arg20[%c0_78, %c0_79], %174 {strides = array<i32>} : memref<6x80xf32, #tpu.memory_space<vmem>>, vector<6x80xf32>,
    %c0_80 = arith.constant 0 : index
    %c0_81 = arith.constant 0 : index
    %176 = tpu.strided_load %arg20[%c0_80, %c0_81] {strides = array<i32: 2, 1>} : memref<6x80xf32, #tpu.memory_space<vmem>>, vector<3x80xf32>
    %c1_82 = arith.constant 1 : index
    %c0_83 = arith.constant 0 : index
    %177 = tpu.strided_load %arg20[%c1_82, %c0_83] {strides = array<i32: 2, 1>} : memref<6x80xf32, #tpu.memory_space<vmem>>, vector<3x80xf32>
    %178 = arith.maximumf %176, %177 : vector<3x80xf32>
    %c0_84 = arith.constant 0 : index
    %c0_85 = arith.constant 0 : index
    %179 = vector.load %arg14[%c0_84, %c0_85] : memref<80x2xf32, #tpu.memory_space<vmem>>, vector<80x2xf32>
    %cst_86 = arith.constant dense<0.000000e+00> : vector<3x2xf32>
    %180 = tpu.matmul %178, %179, %cst_86 {dimension_numbers = #tpu.dot_dimension_numbers<[1], [0], [0], [1], [0, 0, 1, 1], [], []>} : vector<3x80xf32>, vector<80x2xf32>, vector<3x2xf32> -> vector<3x2xf32>
    %c0_87 = arith.constant 0 : index
    %c0_88 = arith.constant 0 : index
    %181 = vector.load %arg15[%c0_87, %c0_88] : memref<1x2xf32, #tpu.memory_space<vmem>>, vector<1x2xf32>
    %182 = vector.broadcast %181 : vector<1x2xf32> to vector<3x2xf32>
    %183 = arith.addf %180, %182 : vector<3x2xf32>
    %c0_89 = arith.constant 0 : index
    %c0_90 = arith.constant 0 : index
    %184 = vector.load %arg16[%c0_89, %c0_90] : memref<80x2xf32, #tpu.memory_space<vmem>>, vector<80x2xf32>
    %cst_91 = arith.constant dense<0.000000e+00> : vector<3x2xf32>
    %185 = tpu.matmul %178, %184, %cst_91 {dimension_numbers = #tpu.dot_dimension_numbers<[1], [0], [0], [1], [0, 0, 1, 1], [], []>} : vector<3x80xf32>, vector<80x2xf32>, vector<3x2xf32> -> vector<3x2xf32>
    %c0_92 = arith.constant 0 : index
    %c0_93 = arith.constant 0 : index
    %186 = vector.load %arg17[%c0_92, %c0_93] : memref<1x2xf32, #tpu.memory_space<vmem>>, vector<1x2xf32>
    %187 = vector.broadcast %186 : vector<1x2xf32> to vector<3x2xf32>
    %188 = arith.addf %185, %187 : vector<3x2xf32>
    %189 = arith.mulf %183, %188 : vector<3x2xf32>
    %cst_94 = arith.constant dense<0.000000e+00> : vector<2xf32>
    %190 = vector.multi_reduction <add>, %189, %cst_94 [0] : vector<3x2xf32> to vector<2xf32>
    %191 = vector.shape_cast %190 : vector<2xf32> to vector<1x2xf32>
    %cst_95 = arith.constant 3.000000e+00 : f32
    %192 = vector.broadcast %cst_95 : f32 to vector<1x2xf32>
    %193 = arith.divf %191, %192 : vector<1x2xf32>
    %cst_96 = arith.constant 5.000000e-01 : f32
    %194 = vector.broadcast %cst_96 : f32 to vector<1x2xf32>
    %195 = arith.mulf %194, %193 : vector<1x2xf32>
    %196 = math.tanh %195 : vector<1x2xf32>
    %cst_97 = arith.constant 1.000000e+00 : f32
    %197 = vector.broadcast %cst_97 : f32 to vector<1x2xf32>
    %198 = arith.addf %196, %197 : vector<1x2xf32>
    %cst_98 = arith.constant 5.000000e-01 : f32
    %199 = vector.broadcast %cst_98 : f32 to vector<1x2xf32>
    %200 = arith.mulf %199, %198 : vector<1x2xf32>
    %c0_99 = arith.constant 0 : index
    %c0_100 = arith.constant 0 : index
    %201 = vector.load %arg18[%c0_99, %c0_100] : memref<1x2xf32, #tpu.memory_space<vmem>>, vector<1x2xf32>
    tpu.vector_store %arg18[%c0_99, %c0_100], %200 {strides = array<i32>} : memref<1x2xf32, #tpu.memory_space<vmem>>, vector<1x2xf32>,
    return
  }
}

</mosaic_0001>

<bundles_post_ra>
// kernel: tpu_custom_call.1
= control target key start
LH: loop header
LB: loop body
LE: loop exit
PB: predicated region body
PF: predicated region fallthrough
CT: control target
= control target key end

     0   :  { %s1653_s0 = inlined_call_operand.vmem [shape: f32[16,16], index: 0, kind: input, shape index: {}]   ;;  %s1654_s1 = inlined_call_operand.vmem [shape: s32[40,1], index: 1, kind: input, shape index: {}]   ;;  %s1655_s2 = inlined_call_operand.vmem [shape: s32[1,40], index: 2, kind: input, shape index: {}]   ;;  %s1656_s3 = inlined_call_operand.vmem [shape: f32[3,32,32], index: 3, kind: input, shape index: {}]   ;;  %s1657_s4 = inlined_call_operand.vmem [shape: f32[32,96], index: 4, kind: input, shape index: {}]   ;;  %s1658_s5 = inlined_call_operand.vmem [shape: f32[32,96], index: 5, kind: input, shape index: {}]   ;;  %s1659_s6 = inlined_call_operand.vmem [shape: f32[1,96], index: 6, kind: input, shape index: {}]   ;;  %s1660_s7 = inlined_call_operand.vmem [shape: f32[1,96], index: 7, kind: input, shape index: {}]   ;;  %s1661_s8 = inlined_call_operand.vmem [shape: f32[240,80], index: 8, kind: input, shape index: {}]   ;;  %s1662_s9 = inlined_call_operand.vmem [shape: f32[1,80], index: 9, kind: input, shape index: {}]   ;;  %s1663_s10 = inlined_call_operand.vmem [shape: f32[80,80], index: 10, kind: input, shape index: {}]   ;;  %s1664_s11 = inlined_call_operand.vmem [shape: f32[1,80], index: 11, kind: input, shape index: {}]   ;;  %s1665_s12 = inlined_call_operand.vmem [shape: f32[1,80], index: 12, kind: input, shape index: {}]   ;;  %s1666_s13 = inlined_call_operand.vmem [shape: f32[1,80], index: 13, kind: input, shape index: {}]   ;;  %s1667_s14 = inlined_call_operand.vmem [shape: f32[80,2], index: 14, kind: input, shape index: {}]   ;;  %s1668_s15 = inlined_call_operand.vmem [shape: f32[1,2], index: 15, kind: input, shape index: {}]   ;;  %s1669_s16 = inlined_call_operand.vmem [shape: f32[80,2], index: 16, kind: input, shape index: {}]   ;;  %s1670_s17 = inlined_call_operand.vmem [shape: f32[1,2], index: 17, kind: input, shape index: {}]   ;;  %s1671_s18 = inlined_call_operand.hbm [shape: f32[1,2], index: 18, kind: output, shape index: {}]  }
   0x1   :  { %1674 = sst [smem:[#allocation7_spill]] %s1653_s0 }
   0x2   :  { %1675 = sst [smem:[#allocation8_spill]] %s1654_s1 }
   0x3   :  { %1676 = sst [smem:[#allocation9_spill]] %s1655_s2 }
   0x4   :  { %s1677_s29 = sld [smem:[#allocation8_spill]]  ;;  %v1094_v2 = vmov 0   ;;  %v156_v4 = vld [vmem:[%s1656_s3 + $0x18] sm:$0xff]  ;;  %v155_v5 = vld [vmem:[%s1656_s3 + $0x10] sm:$0xff]  ;;  %v154_v6 = vld [vmem:[%s1656_s3 + $0x8] sm:$0xff]  ;;  %vm140_vm0 = vcmask 130048  }
   0x5   :  { %1029 = vset.pattern.permute.xlu1 %v1094_v2  ;;  %1028 = vset.pattern.permute.xlu0 %v1094_v2  ;;  %v153_v7 = vld [vmem:[%s1656_s3] sm:$0xff]  ;;  %s1678_s30 = sld [smem:[#allocation7_spill]] }
   0x6   :  { %1030 = vset.pattern.permute.xlu2 %v1094_v2  ;;  %176 = vmatpush.msra.mxu1 %v156_v4 }
   0x8   :  { %177 = vmatpush.msra.mxu1 %v155_v5 }
   0xa   :  { %v67_v0 = vld [vmem:[%s1677_s29 + $0x20] sm:$0xff]  ;;  %v65_v1 = vld [vmem:[%s1677_s29 + $0x10] sm:$0xff] }
   0xb   :  { %v63_v3 = vld [vmem:[%s1677_s29] sm:$0xff]  ;;  %93 = vperm.xlu0 %1028, %v67_v0   ;;  %87 = vperm.xlu1 %1029, %v65_v1  }
   0xc   :  { %81 = vperm.xlu2 %1030, %v63_v3   ;;  %v1222_v8 = vld [vmem:[%s1678_s30] sm:$0xff] }
   0xd   :  { %23 = vsyncpa [#allocation5], 0  ;;  %v66_v9 = vld [vmem:[%s1677_s29 + $0x18] sm:$0xff]  ;;  %v64_v10 = vld [vmem:[%s1677_s29 + $0x8] sm:$0xff]  ;;  %178 = vmatpush.msra.mxu1 %v154_v6  ;;  %v1232_v11 = vsel %vm140_vm0, %v1222_v8, 0.0  ;;  %vm157_vm1 = vcmask 261120   ;;  %v68_v14 = vlaneseq }
   0xe   :  { %v1239_v12 = vld [vmem:[%s1678_s30 + $0x8] sm:$0xff]  ;;  %v1095_v18 = vmov 1.0   ;;  %s1679_s23 = sld [smem:[#allocation9_spill]]  ;;  %v1096_v24 = vmov 0.0   ;;  %vm110_vm8 = vcmask 326656   ;;  %v1253_v30 = vld [vmem:[%s1658_s5 + $0x18] sm:$0xff] }
   0xf   :  { %179 = vmatpush.msra.mxu1 %v153_v7  ;;  %v1243_v13 = vsel %vm140_vm0, %v1239_v12, 0.0  ;;  %v72_v15 = vand.u32 127, %v68_v14  ;;  %v69_v19 = vshrl.u32 %v68_v14, 7  ;;  %v1258_v31 = vld [vmem:[%s1658_s5 + $0x10] sm:$0xff]  ;;  %v1264_v32 = vld [vmem:[%s1658_s5 + $0x8] sm:$0xff]  ;;  %v1270_v33 = vld [vmem:[%s1658_s5] sm:$0xff] }
  0x10   :  { %978 = vmatmul.msk.f32.vlgmr.msra.gmra.mxu1 %vm157_vm1, %v1232_v11  ;;  %v146_v34 = vld [vmem:[%s1657_s4 + $0x18] sm:$0xff]  ;;  %v145_v35 = vld [vmem:[%s1657_s4 + $0x10] sm:$0xff]  ;;  %v144_v36 = vld [vmem:[%s1657_s4 + $0x8] sm:$0xff]  ;;  %s1097_s25 = smov 64   ;;  %vm668_vm10 = vcmask 523264   ;;  %vm685_vm11 = vcmask 1045504  }
  0x11   :  { %v70_v26 = vadd.s32 8, %v69_v19  ;;  %237 = vmatpush.msra.mxu3 %v146_v34  ;;  %v143_v39 = vld [vmem:[%s1657_s4] sm:$0xff]  ;;  %vm675_vm12 = vcmask 1046528   ;;  %vm734_vm13 = vcmask 916480   ;;  %vm695_vm14 = vcmask 654336  }
  0x12   :  { %v1307_v42 = vld [vmem:[%s1660_s7] ss:$0 sm:$0xff]  ;;  %s1099_s7 = smov 96   ;;  %vm800_vm15 = vcmask 652288  }
  0x13   :  { %90 = vperm.xlu0 %1028, %v66_v9   ;;  %84 = vperm.xlu1 %1029, %v64_v10   ;;  %v1316_v47 = vld [vmem:[%s1659_s6] ss:$0 sm:$0xff]  ;;  %s1098_s6 = smov 32  }
  0x14   :  { %v1031_v20 = vld [vmem:[%s1679_s23] ss:$0 sm:$0xff]  ;;  %238 = vmatpush.msra.mxu3 %v145_v35 }
  0x15   :  { %vm74_vm5 = vcmp.eq.s32.totalorder %v69_v19, %v1031_v20  ;;  %vm75_vm9 = vcmp.eq.s32.totalorder %v70_v26, %v1031_v20 }
  0x16   :  { %v964_v25 = vsel %vm74_vm5, 1.0, %v1096_v24  ;;  %v965_v27 = vsel %vm75_vm9, 1.0, %v1096_v24  ;;  %239 = vmatpush.msra.mxu3 %v144_v36  ;;  %v987_v24 = vld [vmem:[%s1656_s3 + $0x28] sm:$0xff] }
  0x18   :  { %979 = vmatmul.msk.f32.gmra.mxu1 %vm157_vm1, %v1243_v13  ;;  %240 = vmatpush.msra.mxu3 %v143_v39 }
  0x66   :  { %v82_v23 = vpop.permute.xlu2 %81 }
  0x67   :  { %vm95_vm7 = vcmp.eq.s32.totalorder %v72_v15, %v82_v23  ;;  %v988_v23 = vld [vmem:[%s1656_s3 + $0x30] sm:$0xff] }
  0x7d   :  { %v94_v16 = vpop.permute.xlu0 %93  ;;  %v88_v17 = vpop.permute.xlu1 %87 }
  0x7e   :  { %vm99_vm2 = vcmp.eq.s32.totalorder %v72_v15, %v94_v16  ;;  %vm97_vm4 = vcmp.eq.s32.totalorder %v72_v15, %v88_v17 }
  0x7f   :  { %971 = vmatpush.msk.msra.mxu0 %vm99_vm2, %v1095_v18  ;;  %vm946_vm2 = vcmask 8192  }
  0x85   :  { %v91_v21 = vpop.permute.xlu0 %90  ;;  %v85_v22 = vpop.permute.xlu1 %84 }
  0x86   :  { %vm98_vm3 = vcmp.eq.s32.totalorder %v72_v15, %v91_v21  ;;  %vm96_vm6 = vcmp.eq.s32.totalorder %v72_v15, %v85_v22 }
  0x87   :  { %972 = vmatpush.msk.msra.mxu0 %vm98_vm3, %v1095_v18 }
  0x89   :  { %973 = vmatpush.msk.msra.mxu0 %vm97_vm4, %v1095_v18 }
  0x8b   :  { %974 = vmatpush.msk.msra.mxu0 %vm96_vm6, %v1095_v18 }
  0x8d   :  { %975 = vmatpush.msk.msra.mxu0 %vm95_vm7, %v1095_v18  ;;  %v181_v28 = vpop.f32.mrf.mxu1 }
  0x8e   :  { %976 = vmatmul.msk.f32.vlgmr.msra.gmra.mxu0 %vm110_vm8, %v964_v25  ;;  %v986_v25 = vld [vmem:[%s1656_s3 + $0x20] sm:$0xff] }
  0x8f   :  { %407 = vmatpush.msrb.mxu0 %v146_v34 }
  0x91   :  { %408 = vmatpush.msrb.mxu0 %v145_v35 }
  0x93   :  { %409 = vmatpush.msrb.mxu0 %v144_v36 }
  0x95   :  { %v184_v29 = vpop.f32.mrf.mxu1  ;;  %410 = vmatpush.msrb.mxu0 %v143_v39 }
  0x96   :  { %977 = vmatmul.msk.f32.gmra.mxu0 %vm110_vm8, %v965_v27  ;;  %207 = vmatpush.msra.mxu2 %v184_v29 }
  0x97   :  { %568 = vmatpush.msra.mxu0 %v146_v34 }
  0x98   :  { %208 = vmatpush.msra.mxu2 %v181_v28 }
  0x99   :  { %569 = vmatpush.msra.mxu0 %v145_v35 }
  0x9a   :  { %263 = vmatpush.msrb.mxu2 %v1253_v30 }
  0x9b   :  { %570 = vmatpush.msra.mxu0 %v144_v36 }
  0x9c   :  { %264 = vmatpush.msrb.mxu2 %v1258_v31 }
  0x9d   :  { %571 = vmatpush.msra.mxu0 %v143_v39 }
  0x9e   :  { %265 = vmatpush.msrb.mxu2 %v1264_v32 }
  0xa0   :  { %266 = vmatpush.msrb.mxu2 %v1270_v33 }
 0x10b   :  { %v1283_v37 = vpop.f32.mrf.mxu0 }
 0x10c   :  { %980 = vmatmul.msk.f32.vlgmr.msra.gmra.mxu2 %vm140_vm0, %v1283_v37 }
 0x10d   :  { %1015 = vmatpush.msra.mxu2 %v146_v34 }
 0x10f   :  { %1016 = vmatpush.msra.mxu2 %v145_v35 }
 0x111   :  { %1017 = vmatpush.msra.mxu2 %v144_v36 }
 0x113   :  { %v1287_v38 = vpop.f32.mrf.mxu0  ;;  %1018 = vmatpush.msra.mxu2 %v143_v39 }
 0x114   :  { %981 = vmatmul.msk.f32.gmra.mxu2 %vm140_vm0, %v1287_v38 }
 0x11c   :  { %984 = vmatmul.msk.f32.vlgmr.msrb.gmra.mxu2 %vm157_vm1, %v1232_v11 }
 0x11d   :  { %430 = vmatpush.msrb.mxu2 %v1253_v30 }
 0x11f   :  { %431 = vmatpush.msrb.mxu2 %v1258_v31 }
 0x121   :  { %432 = vmatpush.msrb.mxu2 %v1264_v32 }
 0x123   :  { %433 = vmatpush.msrb.mxu2 %v1270_v33 }
 0x124   :  { %985 = vmatmul.msk.f32.gmra.mxu2 %vm157_vm1, %v1243_v13 }
 0x18f   :  { %v210_v40 = vpop.f32.mrf.mxu2 }
 0x190   :  { %982 = vmatmul.msk.f32.vlgmr.msra.gmra.mxu3 %vm157_vm1, %v210_v40 }
 0x197   :  { %v213_v41 = vpop.f32.mrf.mxu2 }
 0x198   :  { %983 = vmatmul.msk.f32.gmra.mxu3 %vm157_vm1, %v213_v41 }
 0x19f   :  { %v268_v43 = vpop.f32.mrf.mxu2 }
 0x1a0   :  { %v269_v44 = vadd.f32 %v1307_v42, %v268_v43 }
 0x1a2   :  { %286 = vrot.lane.b32.xlu2 %v269_v44, %s1097_s25 }
 0x1a7   :  { %v271_v45 = vpop.f32.mrf.mxu2 }
 0x1a8   :  { %v272_v46 = vadd.f32 %v1307_v42, %v271_v45 }
 0x1aa   :  { %288 = vrot.lane.b32.xlu0 %v272_v46, %s1097_s25 }
 0x1fc   :  { %v287_v58 = vpop.permute.xlu2 %286 }
 0x213   :  { %v242_v48 = vpop.f32.mrf.mxu3 }
 0x214   :  { %v243_v49 = vadd.f32 %v1316_v47, %v242_v48 }
 0x216   :  { %v274_v50 = vadd.f32 %v269_v44, %v243_v49 }
 0x218   :  { %v276_v51 = vmul.f32 0.5, %v274_v50 }
 0x21a   :  { %1040 = vtanh.f32 %v276_v51 }
 0x21b   :  { %v245_v52 = vpop.f32.mrf.mxu3 }
 0x21c   :  { %v246_v53 = vadd.f32 %v1316_v47, %v245_v52  ;;  %v289_v63 = vpop.permute.xlu0 %288 }
 0x21e   :  { %v275_v54 = vadd.f32 %v272_v46, %v246_v53 }
 0x220   :  { %v1041_v55 = vpop.eup %1040  ;;  %v277_v56 = vmul.f32 0.5, %v275_v54 }
 0x221   :  { %v280_v57 = vadd.f32 1.0, %v1041_v55 }
 0x222   :  { %1042 = vtanh.f32 %v277_v56 }
 0x223   :  { %v282_v59 = vmul.f32 0.5, %v280_v57 }
 0x225   :  { %v292_v60 = vmul.f32 %v287_v58, %v282_v59  ;;  %v306_v10 = vsub.f32 1.0, %v282_v59 }
 0x227   :  { %296 = vrot.lane.b32.xlu1 %v292_v60, %s1097_s25 }
 0x228   :  { %v1043_v61 = vpop.eup %1042 }
 0x229   :  { %v281_v62 = vadd.f32 1.0, %v1043_v61 }
 0x22b   :  { %v283_v0 = vmul.f32 0.5, %v281_v62 }
 0x22d   :  { %v293_v1 = vmul.f32 %v289_v63, %v283_v0  ;;  %v307_v18 = vsub.f32 1.0, %v283_v0 }
 0x22f   :  { %318 = vrot.lane.b32.xlu1 %v1232_v11, %s1098_s6  ;;  %298 = vrot.lane.b32.xlu2 %v293_v1, %s1097_s25  ;;  %v1000_v1 = vld [vmem:[%s1656_s3 + $0x50] sm:$0xff] }
 0x289   :  { %v299_v2 = vpop.permute.xlu2 %298 }
 0x28a   :  { %v303_v3 = vadd.f32 %v299_v2, %v246_v53  ;;  %v999_v2 = vld [vmem:[%s1656_s3 + $0x48] sm:$0xff] }
 0x28c   :  { %1044 = vtanh.f32 %v303_v3  ;;  %v998_v3 = vld [vmem:[%s1656_s3 + $0x40] sm:$0xff] }
 0x292   :  { %v1045_v4 = vpop.eup %1044 }
 0x293   :  { %312 = vrot.lane.b32.xlu2 %v1045_v4, %s1099_s7 }
 0x299   :  { %v297_v5 = vpop.permute.xlu1 %296 }
 0x29a   :  { %v302_v6 = vadd.f32 %v297_v5, %v243_v49 }
 0x29c   :  { %1046 = vtanh.f32 %v302_v6 }
 0x2a1   :  { %v319_v9 = vpop.permute.xlu1 %318 }
 0x2a2   :  { %v1047_v7 = vpop.eup %1046  ;;  %v324_v14 = vmul.f32 %v319_v9, %v282_v59 }
 0x2a3   :  { %310 = vrot.lane.b32.xlu0 %v1047_v7, %s1099_s7 }
 0x2ab   :  { %320 = vrot.lane.b32.xlu0 %v1243_v13, %s1098_s6  ;;  %v989_v13 = vld [vmem:[%s1656_s3 + $0x38] sm:$0xff] }
 0x2ac   :  { %355 = vmatpush.msrb.mxu1 %v989_v13 }
 0x2ae   :  { %356 = vmatpush.msrb.mxu1 %v988_v23 }
 0x2b0   :  { %357 = vmatpush.msrb.mxu1 %v987_v24 }
 0x2b2   :  { %358 = vmatpush.msrb.mxu1 %v986_v25 }
 0x2ed   :  { %v313_v17 = vpop.permute.xlu2 %312 }
 0x2ee   :  { %v317_v20 = vmul.f32 %v313_v17, %v307_v18 }
 0x315   :  { %v311_v11 = vpop.permute.xlu0 %310 }
 0x316   :  { %v316_v15 = vmul.f32 %v311_v11, %v306_v10 }
 0x318   :  { %v1328_v16 = vadd.f32 %v324_v14, %v316_v15 }
 0x31a   :  { %335 = vrot.lane.b32.xlu1 %v1328_v16, %s1099_s7 }
 0x31d   :  { %v321_v19 = vpop.permute.xlu0 %320 }
 0x31e   :  { %v325_v21 = vmul.f32 %v321_v19, %v283_v0  ;;  %v1001_v0 = vld [vmem:[%s1656_s3 + $0x58] sm:$0xff] }
 0x31f   :  { %516 = vmatpush.msra.mxu1 %v1001_v0 }
 0x320   :  { %v1332_v22 = vadd.f32 %v325_v21, %v317_v20 }
 0x321   :  { %517 = vmatpush.msra.mxu1 %v1000_v1 }
 0x322   :  { %337 = vrot.lane.b32.xlu2 %v1332_v22, %s1099_s7 }
 0x323   :  { %518 = vmatpush.msra.mxu1 %v999_v2 }
 0x325   :  { %519 = vmatpush.msra.mxu1 %v998_v3 }
 0x37c   :  { %v338_v27 = vpop.permute.xlu2 %337 }
 0x38c   :  { %v336_v26 = vpop.permute.xlu1 %335 }
 0x38d   :  { %990 = vmatmul.msk.f32.vlgmr.msrb.gmra.mxu1 %vm157_vm1, %v336_v26 }
 0x395   :  { %991 = vmatmul.msk.f32.gmra.mxu1 %vm157_vm1, %v338_v27 }
 0x40a   :  { %v360_v28 = vpop.f32.mrf.mxu1 }
 0x412   :  { %v363_v29 = vpop.f32.mrf.mxu1 }
 0x413   :  { %380 = vmatpush.msrb.mxu3 %v363_v29 }
 0x415   :  { %381 = vmatpush.msrb.mxu3 %v360_v28 }
 0x416   :  { %992 = vmatmul.msk.f32.vlgmr.msrb.gmra.mxu3 %vm140_vm0, %v1283_v37 }
 0x41e   :  { %993 = vmatmul.msk.f32.gmra.mxu3 %vm140_vm0, %v1287_v38 }
 0x499   :  { %v383_v34 = vpop.f32.mrf.mxu3 }
 0x49a   :  { %994 = vmatmul.msk.f32.vlgmr.msrb.gmra.mxu0 %vm157_vm1, %v383_v34 }
 0x4a1   :  { %v386_v35 = vpop.f32.mrf.mxu3 }
 0x4a2   :  { %995 = vmatmul.msk.f32.vlgmr.msra.gmra.mxu2 %vm157_vm1, %v386_v35 }
 0x4a3   :  { %591 = vmatpush.msra.mxu2 %v1253_v30 }
 0x4a5   :  { %592 = vmatpush.msra.mxu2 %v1258_v31 }
 0x4a7   :  { %593 = vmatpush.msra.mxu2 %v1264_v32 }
 0x4a9   :  { %594 = vmatpush.msra.mxu2 %v1270_v33 }
 0x4aa   :  { %996 = vmatmul.msk.f32.vlgmr.msrb.gmra.mxu2 %vm157_vm1, %v336_v26 }
 0x4b2   :  { %997 = vmatmul.msk.f32.gmra.mxu2 %vm157_vm1, %v338_v27 }
 0x517   :  { %v412_v30 = vpop.f32.mrf.mxu0 }
 0x518   :  { %v413_v31 = vadd.f32 %v1316_v47, %v412_v30 }
 0x525   :  { %v415_v36 = vpop.f32.mrf.mxu2 }
 0x526   :  { %v416_v44 = vadd.f32 %v1316_v47, %v415_v36 }
 0x52d   :  { %v435_v39 = vpop.f32.mrf.mxu2 }
 0x52e   :  { %v436_v40 = vadd.f32 %v1307_v42, %v435_v39 }
 0x530   :  { %453 = vrot.lane.b32.xlu0 %v436_v40, %s1097_s25  ;;  %v441_v32 = vadd.f32 %v436_v40, %v413_v31 }
 0x532   :  { %v443_v33 = vmul.f32 0.5, %v441_v32 }
 0x534   :  { %1048 = vtanh.f32 %v443_v33 }
 0x535   :  { %v438_v41 = vpop.f32.mrf.mxu2 }
 0x536   :  { %v439_v43 = vadd.f32 %v1307_v42, %v438_v41 }
 0x538   :  { %455 = vrot.lane.b32.xlu1 %v439_v43, %s1097_s25  ;;  %v442_v45 = vadd.f32 %v439_v43, %v416_v44 }
 0x53a   :  { %v444_v46 = vmul.f32 0.5, %v442_v45  ;;  %v1049_v48 = vpop.eup %1048 }
 0x53b   :  { %v447_v49 = vadd.f32 1.0, %v1049_v48 }
 0x53c   :  { %1050 = vtanh.f32 %v444_v46 }
 0x53d   :  { %v449_v50 = vmul.f32 0.5, %v447_v49 }
 0x53f   :  { %v473_v4 = vsub.f32 1.0, %v449_v50  ;;  %v485_v6 = vmul.f32 %v449_v50, %v1328_v16 }
 0x542   :  { %v1051_v51 = vpop.eup %1050 }
 0x543   :  { %v448_v54 = vadd.f32 1.0, %v1051_v51 }
 0x545   :  { %v450_v55 = vmul.f32 0.5, %v448_v54 }
 0x547   :  { %v474_v10 = vsub.f32 1.0, %v450_v55  ;;  %v486_v14 = vmul.f32 %v450_v55, %v1332_v22 }
 0x5a2   :  { %v454_v52 = vpop.permute.xlu0 %453 }
 0x5a3   :  { %v459_v53 = vmul.f32 %v454_v52, %v449_v50 }
 0x5a5   :  { %463 = vrot.lane.b32.xlu2 %v459_v53, %s1097_s25 }
 0x5aa   :  { %v456_v56 = vpop.permute.xlu1 %455 }
 0x5ab   :  { %v460_v57 = vmul.f32 %v456_v56, %v450_v55 }
 0x5ad   :  { %465 = vrot.lane.b32.xlu0 %v460_v57, %s1097_s25 }
 0x5ff   :  { %v464_v58 = vpop.permute.xlu2 %463 }
 0x600   :  { %v469_v59 = vadd.f32 %v464_v58, %v413_v31 }
 0x602   :  { %1052 = vtanh.f32 %v469_v59 }
 0x608   :  { %v1053_v60 = vpop.eup %1052 }
 0x609   :  { %477 = vrot.lane.b32.xlu1 %v1053_v60, %s1099_s7  ;;  %v714_v60 = vld [vmem:[%s1661_s8 + $0x70] sm:$0xff] }
 0x61f   :  { %v466_v61 = vpop.permute.xlu0 %465 }
 0x620   :  { %v470_v62 = vadd.f32 %v466_v61, %v416_v44  ;;  %v729_v61 = vld [vmem:[%s1661_s8 + $0xe8] sm:$0xff] }
 0x622   :  { %1054 = vtanh.f32 %v470_v62  ;;  %v713_v62 = vld [vmem:[%s1661_s8 + $0x68] sm:$0xff] }
 0x628   :  { %v1055_v63 = vpop.eup %1054 }
 0x629   :  { %479 = vrot.lane.b32.xlu2 %v1055_v63, %s1099_s7 }
 0x67b   :  { %v478_v5 = vpop.permute.xlu1 %477 }
 0x67c   :  { %v483_v7 = vmul.f32 %v478_v5, %v473_v4 }
 0x67e   :  { %v1385_v9 = vadd.f32 %v485_v6, %v483_v7 }
 0x680   :  { %496 = vrot.lane.b32.xlu0 %v1385_v9, %s1099_s7 }
 0x683   :  { %v480_v11 = vpop.permute.xlu2 %479 }
 0x684   :  { %v484_v15 = vmul.f32 %v480_v11, %v474_v10 }
 0x686   :  { %v488_v17 = vadd.f32 %v486_v14, %v484_v15  ;;  %v712_v15 = vld [vmem:[%s1661_s8 + $0x60] sm:$0xff] }
 0x688   :  { %498 = vrot.lane.b32.xlu1 %v488_v17, %s1099_s7 }
 0x6f2   :  { %v497_v18 = vpop.permute.xlu0 %496 }
 0x6f3   :  { %1002 = vmatmul.msk.f32.vlgmr.msra.gmra.mxu1 %vm157_vm1, %v497_v18  ;;  %1008 = vmatmul.msk.f32.vlgmr.msra.gmra.mxu2 %vm157_vm1, %v497_v18  ;;  %v711_v18 = vld [vmem:[%s1661_s8 + $0x58] sm:$0xff] }
 0x6fa   :  { %v499_v16 = vpop.permute.xlu1 %498 }
 0x6fb   :  { %1003 = vmatmul.msk.f32.gmra.mxu1 %vm157_vm1, %v499_v16  ;;  %1009 = vmatmul.msk.f32.gmra.mxu2 %vm157_vm1, %v499_v16  ;;  %v727_v16 = vld [vmem:[%s1661_s8 + $0xd8] sm:$0xff] }
 0x770   :  { %v521_v19 = vpop.f32.mrf.mxu1 }
 0x776   :  { %v596_v20 = vpop.f32.mrf.mxu2 }
 0x777   :  { %v597_v21 = vadd.f32 %v1307_v42, %v596_v20  ;;  %v726_v20 = vld [vmem:[%s1661_s8 + $0xd0] sm:$0xff] }
 0x778   :  { %v524_v13 = vpop.f32.mrf.mxu1 }
 0x779   :  { %614 = vrot.lane.b32.xlu2 %v597_v21, %s1097_s25  ;;  %541 = vmatpush.msra.mxu3 %v524_v13  ;;  %v725_v13 = vld [vmem:[%s1661_s8 + $0xc8] sm:$0xff] }
 0x77b   :  { %542 = vmatpush.msra.mxu3 %v521_v19  ;;  %v710_v19 = vld [vmem:[%s1661_s8 + $0x50] sm:$0xff] }
 0x77c   :  { %1004 = vmatmul.msk.f32.vlgmr.msra.gmra.mxu3 %vm140_vm0, %v1283_v37 }
 0x77d   :  { %766 = vmatpush.msrb.mxu3 %v729_v61 }
 0x77e   :  { %v599_v22 = vpop.f32.mrf.mxu2 }
 0x77f   :  { %v600_v23 = vadd.f32 %v1307_v42, %v599_v22  ;;  %v708_v22 = vld [vmem:[%s1661_s8 + $0x40] sm:$0xff] }
 0x781   :  { %616 = vrot.lane.b32.xlu0 %v600_v23, %s1097_s25 }
 0x784   :  { %1005 = vmatmul.msk.f32.gmra.mxu3 %vm140_vm0, %v1287_v38  ;;  %vm926_vm0 = vcmask 10240  }
 0x7d3   :  { %v615_v40 = vpop.permute.xlu2 %614 }
 0x7f3   :  { %v617_v32 = vpop.permute.xlu0 %616 }
 0x7ff   :  { %v544_v24 = vpop.f32.mrf.mxu3 }
 0x800   :  { %1006 = vmatmul.msk.f32.vlgmr.msra.gmra.mxu0 %vm157_vm1, %v544_v24  ;;  %v707_v24 = vld [vmem:[%s1661_s8 + $0x38] sm:$0xff] }
 0x807   :  { %v547_v25 = vpop.f32.mrf.mxu3 }
 0x808   :  { %1007 = vmatmul.msk.f32.gmra.mxu0 %vm157_vm1, %v547_v25  ;;  %v723_v25 = vld [vmem:[%s1661_s8 + $0xb8] sm:$0xff] }
 0x87d   :  { %v573_v26 = vpop.f32.mrf.mxu0 }
 0x87e   :  { %v574_v27 = vadd.f32 %v1316_v47, %v573_v26  ;;  %v706_v26 = vld [vmem:[%s1661_s8 + $0x30] sm:$0xff] }
 0x880   :  { %v602_v28 = vadd.f32 %v597_v21, %v574_v27  ;;  %v709_v21 = vld [vmem:[%s1661_s8 + $0x48] sm:$0xff] }
 0x882   :  { %v604_v29 = vmul.f32 0.5, %v602_v28  ;;  %v705_v28 = vld [vmem:[%s1661_s8 + $0x28] sm:$0xff] }
 0x884   :  { %1056 = vtanh.f32 %v604_v29  ;;  %v721_v29 = vld [vmem:[%s1661_s8 + $0xa8] sm:$0xff] }
 0x885   :  { %v576_v37 = vpop.f32.mrf.mxu0 }
 0x886   :  { %v577_v42 = vadd.f32 %v1316_v47, %v576_v37  ;;  %v704_v37 = vld [vmem:[%s1661_s8 + $0x20] sm:$0xff] }
 0x888   :  { %v603_v34 = vadd.f32 %v600_v23, %v577_v42  ;;  %v724_v23 = vld [vmem:[%s1661_s8 + $0xc0] sm:$0xff] }
 0x88a   :  { %v1057_v35 = vpop.eup %1056  ;;  %v605_v36 = vmul.f32 0.5, %v603_v34  ;;  %v703_v34 = vld [vmem:[%s1661_s8 + $0x18] sm:$0xff] }
 0x88b   :  { %v608_v39 = vadd.f32 1.0, %v1057_v35  ;;  %v719_v35 = vld [vmem:[%s1661_s8 + $0x98] sm:$0xff] }
 0x88c   :  { %1058 = vtanh.f32 %v605_v36  ;;  %v702_v36 = vld [vmem:[%s1661_s8 + $0x10] sm:$0xff] }
 0x88d   :  { %v610_v38 = vmul.f32 0.5, %v608_v39  ;;  %v718_v39 = vld [vmem:[%s1661_s8 + $0x90] sm:$0xff] }
 0x88f   :  { %v620_v41 = vmul.f32 %v615_v40, %v610_v38  ;;  %v634_v55 = vsub.f32 1.0, %v610_v38  ;;  %v646_v57 = vmul.f32 %v610_v38, %v1385_v9  ;;  %v701_v38 = vld [vmem:[%s1661_s8 + $0x8] sm:$0xff] }
 0x890   :  { %v717_v40 = vld [vmem:[%s1661_s8 + $0x88] sm:$0xff] }
 0x891   :  { %624 = vrot.lane.b32.xlu1 %v620_v41, %s1097_s25  ;;  %v700_v41 = vld [vmem:[%s1661_s8] sm:$0xff] }
 0x892   :  { %v1059_v43 = vpop.eup %1058 }
 0x893   :  { %v609_v30 = vadd.f32 1.0, %v1059_v43  ;;  %v716_v43 = vld [vmem:[%s1661_s8 + $0x80] sm:$0xff] }
 0x895   :  { %v611_v31 = vmul.f32 0.5, %v609_v30 }
 0x897   :  { %v621_v33 = vmul.f32 %v617_v32, %v611_v31  ;;  %v635_v50 = vsub.f32 1.0, %v611_v31  ;;  %v647_v52 = vmul.f32 %v611_v31, %v488_v17  ;;  %v728_v17 = vld [vmem:[%s1661_s8 + $0xe0] sm:$0xff] }
 0x898   :  { %767 = vmatpush.msrb.mxu3 %v728_v17 }
 0x899   :  { %626 = vrot.lane.b32.xlu2 %v621_v33, %s1097_s25 }
 0x89a   :  { %768 = vmatpush.msrb.mxu3 %v727_v16  ;;  %v900_v16 = vld [vmem:[%s1669_s16 + $0x48] sm:$0xff] }
 0x89c   :  { %769 = vmatpush.msrb.mxu3 %v726_v20  ;;  %v899_v20 = vld [vmem:[%s1669_s16 + $0x40] sm:$0xff] }
 0x89e   :  { %770 = vmatpush.msrb.mxu3 %v725_v13  ;;  %v898_v13 = vld [vmem:[%s1669_s16 + $0x38] sm:$0xff] }
 0x8a0   :  { %771 = vmatpush.msrb.mxu3 %v724_v23  ;;  %v897_v23 = vld [vmem:[%s1669_s16 + $0x30] sm:$0xff] }
 0x8a2   :  { %772 = vmatpush.msrb.mxu3 %v723_v25  ;;  %v896_v25 = vld [vmem:[%s1669_s16 + $0x28] sm:$0xff] }
 0x8f3   :  { %v627_v44 = vpop.permute.xlu2 %626 }
 0x8f4   :  { %v631_v45 = vadd.f32 %v627_v44, %v577_v42  ;;  %v720_v42 = vld [vmem:[%s1661_s8 + $0xa0] sm:$0xff] }
 0x8f6   :  { %1060 = vtanh.f32 %v631_v45 }
 0x8fc   :  { %v1061_v47 = vpop.eup %1060 }
 0x8fd   :  { %640 = vrot.lane.b32.xlu1 %v1061_v47, %s1099_s7 }
 0x903   :  { %v625_v46 = vpop.permute.xlu1 %624 }
 0x904   :  { %v630_v48 = vadd.f32 %v625_v46, %v574_v27  ;;  %v722_v27 = vld [vmem:[%s1661_s8 + $0xb0] sm:$0xff] }
 0x905   :  { %660 = vrot.lane.b32.xlu1 %v1222_v8, %s1097_s25  ;;  %v715_v8 = vld [vmem:[%s1661_s8 + $0x78] sm:$0xff]  ;;  %773 = vmatpush.msrb.mxu3 %v722_v27  ;;  %v895_v27 = vld [vmem:[%s1669_s16 + $0x20] sm:$0xff]  ;;  %s955_s8 = sshll.u32 %s1671_s18, 4  ;;  %s956_s8 = int_to_ptr.hbm [resolvable:$true] %s955_s8 }
 0x906   :  { %1062 = vtanh.f32 %v630_v48  ;;  %741 = vmatpush.msrb.mxu1 %v715_v8  ;;  %v818_v48 = vld [vmem:[%s1663_s10 + $0x48] sm:$0xff] }
 0x907   :  { %774 = vmatpush.msrb.mxu3 %v721_v29  ;;  %832 = vmatpush.msrb.mxu0 %v818_v48  ;;  %v894_v29 = vld [vmem:[%s1669_s16 + $0x18] sm:$0xff]  ;;  %v1039_v48 = vld [vmem:[%s1668_s15] ss:$0 sm:$0xff]  ;;  %s1102_s15 = smov [#allocation4]  }
 0x908   :  { %742 = vmatpush.msrb.mxu1 %v714_v60  ;;  %v1562_v60 = vld [vmem:[%s1665_s12] ss:$0 sm:$0xff] }
 0x909   :  { %775 = vmatpush.msrb.mxu3 %v720_v42  ;;  %v893_v42 = vld [vmem:[%s1669_s16 + $0x10] sm:$0xff] }
 0x90a   :  { %743 = vmatpush.msrb.mxu1 %v713_v62 }
 0x90b   :  { %776 = vmatpush.msrb.mxu3 %v719_v35  ;;  %v892_v35 = vld [vmem:[%s1669_s16 + $0x8] sm:$0xff] }
 0x90c   :  { %v1063_v49 = vpop.eup %1062  ;;  %744 = vmatpush.msrb.mxu1 %v712_v15 }
 0x90d   :  { %638 = vrot.lane.b32.xlu0 %v1063_v49, %s1099_s7  ;;  %777 = vmatpush.msrb.mxu3 %v718_v39  ;;  %v817_v49 = vld [vmem:[%s1663_s10 + $0x40] sm:$0xff] }
 0x90e   :  { %745 = vmatpush.msrb.mxu1 %v711_v18  ;;  %833 = vmatpush.msrb.mxu0 %v817_v49  ;;  %v863_v18 = vld [vmem:[%s1667_s14 + $0x48] sm:$0xff]  ;;  %v891_v39 = vld [vmem:[%s1669_s16] sm:$0xff] }
 0x90f   :  { %778 = vmatpush.msrb.mxu3 %v717_v40  ;;  %877 = vmatpush.msrb.mxu2 %v863_v18 }
 0x910   :  { %746 = vmatpush.msrb.mxu1 %v710_v19  ;;  %v862_v19 = vld [vmem:[%s1667_s14 + $0x40] sm:$0xff] }
 0x911   :  { %779 = vmatpush.msrb.mxu3 %v716_v43  ;;  %878 = vmatpush.msrb.mxu2 %v862_v19 }
 0x912   :  { %747 = vmatpush.msrb.mxu1 %v709_v21  ;;  %v861_v21 = vld [vmem:[%s1667_s14 + $0x38] sm:$0xff] }
 0x913   :  { %879 = vmatpush.msrb.mxu2 %v861_v21 }
 0x914   :  { %748 = vmatpush.msrb.mxu1 %v708_v22  ;;  %v860_v22 = vld [vmem:[%s1667_s14 + $0x30] sm:$0xff] }
 0x915   :  { %880 = vmatpush.msrb.mxu2 %v860_v22 }
 0x916   :  { %749 = vmatpush.msrb.mxu1 %v707_v24  ;;  %v859_v24 = vld [vmem:[%s1667_s14 + $0x28] sm:$0xff] }
 0x917   :  { %881 = vmatpush.msrb.mxu2 %v859_v24 }
 0x918   :  { %750 = vmatpush.msrb.mxu1 %v706_v26  ;;  %v858_v26 = vld [vmem:[%s1667_s14 + $0x20] sm:$0xff] }
 0x919   :  { %882 = vmatpush.msrb.mxu2 %v858_v26 }
 0x91a   :  { %751 = vmatpush.msrb.mxu1 %v705_v28  ;;  %v857_v28 = vld [vmem:[%s1667_s14 + $0x18] sm:$0xff] }
 0x91b   :  { %883 = vmatpush.msrb.mxu2 %v857_v28 }
 0x91c   :  { %752 = vmatpush.msrb.mxu1 %v704_v37  ;;  %v856_v37 = vld [vmem:[%s1667_s14 + $0x10] sm:$0xff] }
 0x91d   :  { %884 = vmatpush.msrb.mxu2 %v856_v37 }
 0x91e   :  { %753 = vmatpush.msrb.mxu1 %v703_v34  ;;  %v855_v34 = vld [vmem:[%s1667_s14 + $0x8] sm:$0xff] }
 0x91f   :  { %885 = vmatpush.msrb.mxu2 %v855_v34 }
 0x920   :  { %754 = vmatpush.msrb.mxu1 %v702_v36  ;;  %v854_v36 = vld [vmem:[%s1667_s14] sm:$0xff] }
 0x921   :  { %886 = vmatpush.msrb.mxu2 %v854_v36 }
 0x922   :  { %755 = vmatpush.msrb.mxu1 %v701_v38  ;;  %v1037_v38 = vld [vmem:[%s1664_s11] ss:$0 sm:$0xff] }
 0x924   :  { %756 = vmatpush.msrb.mxu1 %v700_v41 }
 0x96f   :  { %v641_v51 = vpop.permute.xlu1 %640 }
 0x970   :  { %v645_v53 = vmul.f32 %v641_v51, %v635_v50  ;;  %v816_v50 = vld [vmem:[%s1663_s10 + $0x38] sm:$0xff]  ;;  %v815_v51 = vld [vmem:[%s1663_s10 + $0x30] sm:$0xff] }
 0x971   :  { %834 = vmatpush.msrb.mxu0 %v816_v50 }
 0x972   :  { %v649_v54 = vadd.f32 %v647_v52, %v645_v53  ;;  %v814_v52 = vld [vmem:[%s1663_s10 + $0x28] sm:$0xff]  ;;  %v813_v53 = vld [vmem:[%s1663_s10 + $0x20] sm:$0xff] }
 0x973   :  { %835 = vmatpush.msrb.mxu0 %v815_v51 }
 0x974   :  { %654 = vrot.lane.b32.xlu0 %v649_v54, %s1099_s7 }
 0x975   :  { %836 = vmatpush.msrb.mxu0 %v814_v52 }
 0x977   :  { %v661_v0 = vpop.permute.xlu1 %660  ;;  %837 = vmatpush.msrb.mxu0 %v813_v53 }
 0x97f   :  { %v639_v56 = vpop.permute.xlu0 %638 }
 0x980   :  { %v644_v58 = vmul.f32 %v639_v56, %v634_v55  ;;  %v811_v55 = vld [vmem:[%s1663_s10 + $0x10] sm:$0xff]  ;;  %v810_v56 = vld [vmem:[%s1663_s10 + $0x8] sm:$0xff] }
 0x982   :  { %v648_v59 = vadd.f32 %v646_v57, %v644_v58  ;;  %v809_v57 = vld [vmem:[%s1663_s10] sm:$0xff] }
 0x984   :  { %652 = vrot.lane.b32.xlu2 %v648_v59, %s1099_s7 }
 0x98c   :  { %662 = vrot.lane.b32.xlu2 %v1239_v12, %s1097_s25  ;;  %s1100_s25 = smov 80  }
 0x9de   :  { %v653_v12 = vpop.permute.xlu2 %652 }
 0x9df   :  { %v666_v63 = vsel %vm157_vm1, %v653_v12, %v648_v59  ;;  %v1034_v59 = vld [vmem:[%s1662_s9] ss:$0 sm:$0xff] }
 0x9e0   :  { %v1431_v1 = vsel %vm668_vm10, %v666_v63, %v661_v0  ;;  %v1567_v12 = vld [vmem:[%s1666_s13] ss:$0 sm:$0xff] }
 0x9e1   :  { %v676_v6 = vrot.slane %v1431_v1, 1  ;;  %v686_v7 = vrot.slane %v1431_v1, 2 }
 0x9e6   :  { %v655_v2 = vpop.permute.xlu0 %654  ;;  %v663_v3 = vpop.permute.xlu2 %662 }
 0x9e7   :  { %v667_v4 = vsel %vm157_vm1, %v655_v2, %v649_v54  ;;  %v812_v54 = vld [vmem:[%s1663_s10 + $0x18] sm:$0xff] }
 0x9e8   :  { %v1434_v5 = vsel %vm668_vm10, %v667_v4, %v663_v3  ;;  %838 = vmatpush.msrb.mxu0 %v812_v54 }
 0x9e9   :  { %v687_v9 = vrot.slane %v1434_v5, 2  ;;  %v677_v10 = vrot.slane %v1434_v5, 1 }
 0x9ea   :  { %839 = vmatpush.msrb.mxu0 %v811_v55 }
 0x9eb   :  { %681 = vrot.lane.b32.xlu2 %v677_v10, %s1100_s25  ;;  %v688_v11 = vsel %vm685_vm11, %v686_v7, %v687_v9  ;;  %v678_v14 = vsel %vm675_vm12, %v676_v6, %v677_v10 }
 0x9ec   :  { %689 = vrot.lane.b32.xlu1 %v688_v11, %s1098_s6  ;;  %679 = vrot.lane.b32.xlu0 %v678_v14, %s1100_s25 }
 0x9ed   :  { %840 = vmatpush.msrb.mxu0 %v810_v56 }
 0x9ef   :  { %841 = vmatpush.msrb.mxu0 %v809_v57 }
 0x9f1   :  { %911 = vmatpush.msra.mxu0 %v900_v16 }
 0x9f3   :  { %912 = vmatpush.msra.mxu0 %v899_v20 }
 0x9f4   :  { %691 = vrot.lane.b32.xlu0 %v687_v9, %s1098_s6 }
 0x9f5   :  { %913 = vmatpush.msra.mxu0 %v898_v13 }
 0x9f7   :  { %914 = vmatpush.msra.mxu0 %v897_v23 }
 0x9f9   :  { %915 = vmatpush.msra.mxu0 %v896_v25 }
 0x9fb   :  { %916 = vmatpush.msra.mxu0 %v895_v27 }
 0x9fd   :  { %917 = vmatpush.msra.mxu0 %v894_v29 }
 0x9ff   :  { %918 = vmatpush.msra.mxu0 %v893_v42 }
 0xa01   :  { %919 = vmatpush.msra.mxu0 %v892_v35 }
 0xa03   :  { %920 = vmatpush.msra.mxu0 %v891_v39 }
 0xa45   :  { %v682_v44 = vpop.permute.xlu2 %681 }
 0xa46   :  { %v697_v47 = vsel %vm695_vm14, %v1434_v5, %v682_v44 }
 0xa5e   :  { %v690_v30 = vpop.permute.xlu1 %689  ;;  %v680_v31 = vpop.permute.xlu0 %679 }
 0xa5f   :  { %v696_v32 = vsel %vm695_vm14, %v1431_v1, %v680_v31  ;;  %v698_v33 = vsel %vm157_vm1, %v680_v31, %v690_v30 }
 0xa60   :  { %757 = vmatmul.f32.vlgmr.msrb.gmra.mxu1 %v696_v32  ;;  %1010 = vmatmul.msk.f32.vlgmr.msrb.gmra.mxu3 %vm734_vm13, %v698_v33 }
 0xa66   :  { %v692_v45 = vpop.permute.xlu0 %691 }
 0xa67   :  { %v699_v46 = vsel %vm157_vm1, %v682_v44, %v692_v45  ;;  %v1101_v45 = vmov 3.0  }
 0xa68   :  { %760 = vmatmul.f32.gmra.mxu1 %v697_v47  ;;  %1011 = vmatmul.msk.f32.gmra.mxu3 %vm734_vm13, %v699_v46  ;;  %1064 = vrcp.f32 %v1101_v45  ;;  %v1038_v46 = vld [vmem:[%s1670_s17] ss:$0 sm:$0xff]  ;;  %s953_s17 = sshll.u32 %s1102_s15, 4  ;;  %s954_s17 = int_to_ptr.vmem [resolvable:$true] %s953_s17 }
 0xa6e   :  { %v1065_v47 = vpop.eup %1064 }
 0xa6f   :  { %v935_v50 = vmul.f32 3.0, %v1065_v47  ;;  %vm939_vm1 = vweird.f32 %v1065_v47 }
 0xa71   :  { %v936_v55 = vsub.f32 1.0, %v935_v50 }
 0xadd   :  { %v758_v58 = vpop.f32.mrf.mxu1 }
 0xade   :  { %v759_v8 = vadd.f32 %v1034_v59, %v758_v58  ;;  %v937_v58 = vmul.f32 %v1065_v47, %v936_v55 }
 0xae3   :  { %v781_v61 = vpop.f32.mrf.mxu3 }
 0xae4   :  { %v782_v62 = vadd.f32 %v781_v61, %v759_v8 }
 0xae5   :  { %v761_v0 = vpop.f32.mrf.mxu1 }
 0xae6   :  { %v790_v63 = vmul.f32 %v1562_v60, %v782_v62  ;;  %v762_v3 = vadd.f32 %v1034_v59, %v761_v0 }
 0xae8   :  { %v795_v1 = vadd.f32 %v1567_v12, %v790_v63 }
 0xaea   :  { %v797_v2 = vmax.f32 %v795_v1, 0.0 }
 0xaeb   :  { %v784_v4 = vpop.f32.mrf.mxu3 }
 0xaec   :  { %799 = vst.msk [vmem:[#allocation2] sm:$0xff] %vm695_vm14, %v797_v2  ;;  %v785_v5 = vadd.f32 %v784_v4, %v762_v3 }
 0xaee   :  { %v791_v6 = vmul.f32 %v1562_v60, %v785_v5 }
 0xaf0   :  { %v796_v7 = vadd.f32 %v1567_v12, %v791_v6 }
 0xaf2   :  { %v798_v9 = vmax.f32 %v796_v7, 0.0 }
 0xaf4   :  { %801 = vst.msk [vmem:[#allocation2 + $0x8] sm:$0x3f] %vm800_vm15, %v798_v9 }
 0xafb   :  { %v802_v10 = vld [vmem:[#allocation2] ss:$2 sm:$0x3f]  ;;  %v804_v11 = vld [vmem:[#allocation2 + $0x1] ss:$2 sm:$0x3f] }
 0xafc   :  { %v805_v14 = vmax.f32 %v802_v10, %v804_v11  ;;  %v807_v15 = vld [vmem:[#allocation2 + $0x2] ss:$2 sm:$0x3f] }
 0xafe   :  { %v808_v17 = vmax.f32 %v805_v14, %v807_v15 }
 0xb00   :  { %1012 = vmatmul.msk.f32.vlgmr.msrb.gmra.mxu0 %vm695_vm14, %v808_v17 }
 0xb7d   :  { %v843_v40 = vpop.f32.mrf.mxu0 }
 0xb7e   :  { %v844_v41 = vadd.f32 %v1037_v38, %v843_v40 }
 0xb80   :  { %v846_v43 = vmul.f32 %v1562_v60, %v844_v41  ;;  %v938_v60 = vadd.f32 %v1065_v47, %v937_v58 }
 0xb82   :  { %v847_v30 = vadd.f32 %v1567_v12, %v846_v43  ;;  %v940_v12 = vsel %vm939_vm1, %v1065_v47, %v938_v60 }
 0xb84   :  { %v848_v31 = vmax.f32 %v847_v30, 0.0 }
 0xb86   :  { %849 = vst.msk [vmem:[#allocation3] sm:$0x3f] %vm800_vm15, %v848_v31 }
 0xb8d   :  { %v850_v32 = vld [vmem:[#allocation3] ss:$2 sm:$0x7]  ;;  %v852_v33 = vld [vmem:[#allocation3 + $0x1] ss:$2 sm:$0x7] }
 0xb8e   :  { %v853_v44 = vmax.f32 %v850_v32, %v852_v33 }
 0xb90   :  { %1013 = vmatmul.msk.f32.vlgmr.msrb.gmra.mxu2 %vm695_vm14, %v853_v44  ;;  %1014 = vmatmul.msk.f32.vlgmr.msra.gmra.mxu0 %vm695_vm14, %v853_v44 }
 0xc0d   :  { %v922_v49 = vpop.f32.mrf.mxu0 }
 0xc0e   :  { %v923_v52 = vadd.f32 %v1038_v46, %v922_v49 }
 0xc13   :  { %v888_v51 = vpop.f32.mrf.mxu2 }
 0xc14   :  { %v889_v53 = vadd.f32 %v1039_v48, %v888_v51 }
 0xc16   :  { %v925_v54 = vmul.f32 %v923_v52, %v889_v53 }
 0xc18   :  { %v927_v56 = vsel %vm926_vm0, %v925_v54, 0.0 }
 0xc19   :  { %v928_v57 = vrot.slane %v927_v56, 4 }
 0xc1b   :  { %v929_v59 = vadd.f32 %v928_v57, %v927_v56 }
 0xc1d   :  { %v930_v8 = vrot.slane %v929_v59, 2 }
 0xc1f   :  { %v931_v61 = vadd.f32 %v930_v8, %v929_v59 }
 0xc21   :  { %v932_v62 = vrot.slane %v931_v61, 1 }
 0xc23   :  { %v933_v63 = vadd.f32 %v932_v62, %v931_v61 }
 0xc25   :  { %v941_v0 = vmul.f32 %v940_v12, %v933_v63 }
 0xc27   :  { %v942_v1 = vmul.f32 0.5, %v941_v0 }
 0xc29   :  { %1066 = vtanh.f32 %v942_v1 }
 0xc2f   :  { %v1067_v2 = vpop.eup %1066 }
 0xc30   :  { %v944_v3 = vadd.f32 1.0, %v1067_v2 }
 0xc32   :  { %v945_v4 = vmul.f32 0.5, %v944_v3 }
 0xc34   :  { %947 = vst.msk [vmem:[#allocation4] sm:$0x1] %vm946_vm2, %v945_v4 }
 0xc35   :  { %958 = dma.vmem_to_hbm [thread:$0]  %s954_s17, 16, %s956_s8, [#allocation5]  }
 0xc36   :  { %1092 = dma.done.wait [#allocation5], 16  }
 0xc37   :  { %1093 = vsyncadd [#allocation5], 4294967280 }
 0xc38   :  { %963 = vsyncpa [#allocation5], 1 }

</bundles_post_ra>
